<compile_context>
chip_gen: v5e
topology: v5e:2x2
jax: 0.10.0
libtpu: 0.0.40
codegen_flags: <defaults>
</compile_context>

<pallas_src>
import jax
import jax.numpy as jnp
import numpy as np
from jax.experimental import pallas as pl
from jax.experimental.pallas import tpu as pltpu

LANE = 128
SUBLANE = 8


def _round_up(x, m):
    return ((x + m - 1) // m) * m


def _pad2(a, rows, cols):
    r, c = a.shape
    if r == rows and c == cols:
        return a
    return jnp.pad(a, ((0, rows - r), (0, cols - c)))


def _bn_train(h, gamma, beta, eps):
    """Training-mode BatchNorm1d over axis 0 (fused sum / sum-of-squares)."""
    inv_n = 1.0 / h.shape[0]
    s = jnp.sum(h, axis=0, keepdims=True)
    sq = jnp.sum(h * h, axis=0, keepdims=True)
    mean = s * inv_n
    var = jnp.maximum(sq * inv_n - mean * mean, 0.0)
    scale = gamma * jax.lax.rsqrt(var + eps)      # EUP rsqrt
    shift = beta - mean * scale
    return h * scale + shift


def _make_kernel(include_bn: bool, eps: float):
    def kernel(*refs):
        if include_bn:
            (x_ref, w0_ref, b0_ref, w1_ref, b1_ref, wp_ref, bp_ref,
             g0_ref, be0_ref, g1_ref, be1_ref, o_ref) = refs
        else:
            (x_ref, w0_ref, b0_ref, w1_ref, b1_ref, wp_ref, bp_ref,
             o_ref) = refs

        x = x_ref[...]  # bf16 [block_b, in_fp]

        # Projection first: x is dead after the next matmul -> shorter live
        # range, lower vreg pressure when the batch tile grows.
        p = jnp.dot(x, wp_ref[...], preferred_element_type=jnp.float32) + bp_ref[...]

        h = jnp.dot(x, w0_ref[...], preferred_element_type=jnp.float32) + b0_ref[...]
        h = jnp.maximum(h, 0.0)
        if include_bn:
            h = _bn_train(h, g0_ref[...], be0_ref[...], eps)

        h = jnp.dot(h.astype(jnp.bfloat16), w1_ref[...],
                    preferred_element_type=jnp.float32) + b1_ref[...]
        h = jnp.maximum(h, 0.0)
        if include_bn:
            h = _bn_train(h, g1_ref[...], be1_ref[...], eps)

        o_ref[...] = jnp.maximum(h + p, 0.0)

    return kernel


def residual_block_forward(x, params, *, include_bn: bool, eps: float = 1e-5,
                           batch_block: int = 256):
    """ResidualBlock forward as a single batch-tiled Pallas kernel."""
    B, in_f = x.shape
    interim_f = params["w0"].shape[1]
    out_f = params["wp"].shape[1]

    # Lane-dense feature padding (multiples of 128).
    in_fp = _round_up(in_f, LANE)
    int_fp = _round_up(interim_f, LANE)
    out_fp = _round_up(out_f, LANE)

    if include_bn:
        # BatchNorm needs full-batch statistics -> whole batch in one block.
        block_b = B
        b_pad = B
    else:
        block_b = min(_round_up(B, SUBLANE), batch_block)
        b_pad = _round_up(B, block_b)
    grid_b = b_pad // block_b

    # Pad, then cast matmul operands to bf16 (biases / BN params stay f32).
    xp = _pad2(x, b_pad, in_fp).astype(jnp.bfloat16)
    w0 = _pad2(params["w0"], in_fp, int_fp).astype(jnp.bfloat16)
    w1 = _pad2(params["w1"], int_fp, out_fp).astype(jnp.bfloat16)
    wp = _pad2(params["wp"], in_fp, out_fp).astype(jnp.bfloat16)
    b0 = _pad2(params["b0"], 1, int_fp)
    b1 = _pad2(params["b1"], 1, out_fp)
    bp = _pad2(params["bp"], 1, out_fp)

    args = [xp, w0, b0, w1, b1, wp, bp]
    # x/out blocked along batch; weights & biases resident at block (0, 0).
    in_specs = [pl.BlockSpec((block_b, in_fp), lambda i: (i, 0))]
    in_specs += [pl.BlockSpec(a.shape, lambda i: (0, 0))
                 for a in (w0, b0, w1, b1, wp, bp)]

    if include_bn:
        g0 = _pad2(params["g0"], 1, int_fp)
        be0 = _pad2(params["be0"], 1, int_fp)
        g1 = _pad2(params["g1"], 1, out_fp)
        be1 = _pad2(params["be1"], 1, out_fp)
        args += [g0, be0, g1, be1]
        in_specs += [pl.BlockSpec(a.shape, lambda i: (0, 0))
                     for a in (g0, be0, g1, be1)]

    out_spec = pl.BlockSpec((block_b, out_fp), lambda i: (i, 0))

    flops = 2 * b_pad * (in_fp * int_fp + int_fp * out_fp + in_fp * out_fp)
    bytes_accessed = int(sum(int(np.prod(a.shape)) * a.dtype.itemsize for a in args)
                         + b_pad * out_fp * 4)
    cost = pl.CostEstimate(
        flops=flops,
        transcendentals=(int_fp + out_fp) if include_bn else 0,
        bytes_accessed=bytes_accessed,
    )

    out = pl.pallas_call(
        _make_kernel(include_bn, eps),
        out_shape=jax.ShapeDtypeStruct((b_pad, out_fp), jnp.float32),
        grid_spec=pltpu.PrefetchScalarGridSpec(
            num_scalar_prefetch=0,
            grid=(grid_b,),
            in_specs=in_specs,
            out_specs=out_spec,
        ),
        compiler_params=pltpu.CompilerParams(
            dimension_semantics=("parallel",),
            vmem_limit_bytes=48 * 1024 * 1024,
        ),
        cost_estimate=cost,
    )(*args)

    return out[:B, :out_f]


def init_params(key, in_f, interim_f, out_f, include_bn):
    """Deterministic synthetic init (PyTorch-like fan-in uniform scale)."""
    ks = jax.random.split(key, 8)

    def lin(kw, kb, fin, fout):
        bound = 1.0 / np.sqrt(fin)
        w = jax.random.uniform(kw, (fin, fout), jnp.float32, -bound, bound)
        b = jax.random.uniform(kb, (1, fout), jnp.float32, -bound, bound)
        return w, b

    w0, b0 = lin(ks[0], ks[1], in_f, interim_f)   # lin0
    w1, b1 = lin(ks[2], ks[3], interim_f, out_f)  # lin1
    wp, bp = lin(ks[4], ks[5], in_f, out_f)       # lin_projection

    params = {"w0": w0, "b0": b0, "w1": w1, "b1": b1, "wp": wp, "bp": bp}
    if include_bn:
        params["g0"] = jnp.ones((1, interim_f), jnp.float32)
        params["be0"] = jnp.zeros((1, interim_f), jnp.float32)
        params["g1"] = jnp.ones((1, out_f), jnp.float32)
        params["be1"] = jnp.zeros((1, out_f), jnp.float32)
    return params


def _ref_bn(h, g, be, eps):
    m = h.mean(0, keepdims=True)
    v = ((h - m) ** 2).mean(0, keepdims=True)
    return (h - m) / jnp.sqrt(v + eps) * g + be


def reference_forward_f32(x, params, *, include_bn, eps=1e-5):
    """Plain-JAX f32 reference mirroring the PyTorch forward (training BN)."""
    h = jnp.maximum(x @ params["w0"] + params["b0"], 0.0)
    if include_bn:
        h = _ref_bn(h, params["g0"], params["be0"], eps)
    h = jnp.maximum(h @ params["w1"] + params["b1"], 0.0)
    if include_bn:
        h = _ref_bn(h, params["g1"], params["be1"], eps)
    p = x @ params["wp"] + params["bp"]
    return jnp.maximum(h + p, 0.0)


def reference_forward_bf16(x, params, *, include_bn, eps=1e-5):
    """Reference with the same bf16-matmul / f32-accumulate scheme as the kernel."""
    bf = jnp.bfloat16
    xb = x.astype(bf)
    h = jnp.dot(xb, params["w0"].astype(bf),
                preferred_element_type=jnp.float32) + params["b0"]
    h = jnp.maximum(h, 0.0)
    if include_bn:
        h = _ref_bn(h, params["g0"], params["be0"], eps)
    h = jnp.dot(h.astype(bf), params["w1"].astype(bf),
                preferred_element_type=jnp.float32) + params["b1"]
    h = jnp.maximum(h, 0.0)
    if include_bn:
        h = _ref_bn(h, params["g1"], params["be1"], eps)
    p = jnp.dot(xb, params["wp"].astype(bf),
                preferred_element_type=jnp.float32) + params["bp"]
    return jnp.maximum(h + p, 0.0)


if __name__ == "__main__":
    key = jax.random.PRNGKey(0)
    kx, kp, kp2, kx3, kp3 = jax.random.split(key, 5)

    # --- Case 1: include_bn=False, small rectangular dims ---
    B, IN_F, INT_F, OUT_F = 8, 32, 64, 48
    x = jax.random.normal(kx, (B, IN_F), jnp.float32)
    params = init_params(kp, IN_F, INT_F, OUT_F, include_bn=False)

    out = jax.block_until_ready(residual_block_forward(x, params, include_bn=False))
    np.testing.assert_allclose(
        np.asarray(out), np.asarray(reference_forward_bf16(x, params, include_bn=False)),
        rtol=2e-3, atol=2e-3)
    np.testing.assert_allclose(
        np.asarray(out), np.asarray(reference_forward_f32(x, params, include_bn=False)),
        rtol=5e-2, atol=5e-2)

    # --- Case 2: include_bn=True (requires in == interim == out, as in PyTorch) ---
    F = 32
    x2 = jax.random.normal(kx, (B, F), jnp.float32)
    params2 = init_params(kp2, F, F, F, include_bn=True)

    out2 = jax.block_until_ready(residual_block_forward(x2, params2, include_bn=True))
    np.testing.assert_allclose(
        np.asarray(out2), np.asarray(reference_forward_bf16(x2, params2, include_bn=True)),
        rtol=2e-3, atol=2e-3)
    np.testing.assert_allclose(
        np.asarray(out2), np.asarray(reference_forward_f32(x2, params2, include_bn=True)),
        rtol=5e-2, atol=5e-2)

    # --- Case 3: larger batch exercising the tiled (multi-step, padded) grid ---
    B3, IN3, INT3, OUT3 = 384, 128, 256, 192
    x3 = jax.random.normal(kx3, (B3, IN3), jnp.float32)
    params3 = init_params(kp3, IN3, INT3, OUT3, include_bn=False)

    out3 = jax.block_until_ready(residual_block_forward(x3, params3, include_bn=False))
    np.testing.assert_allclose(
        np.asarray(out3), np.asarray(reference_forward_bf16(x3, params3, include_bn=False)),
        rtol=2e-3, atol=2e-3)

    print("KERNEL_OK")
</pallas_src>

<mosaic_0001>
module attributes {stable_mosaic.version = 11 : i64} {
  func.func @kernel(%arg0: i32, %arg1: memref<8x128xbf16, #tpu.memory_space<vmem>>, %arg2: memref<128x128xbf16, #tpu.memory_space<vmem>>, %arg3: memref<1x128xf32, #tpu.memory_space<vmem>>, %arg4: memref<128x128xbf16, #tpu.memory_space<vmem>>, %arg5: memref<1x128xf32, #tpu.memory_space<vmem>>, %arg6: memref<128x128xbf16, #tpu.memory_space<vmem>>, %arg7: memref<1x128xf32, #tpu.memory_space<vmem>>, %arg8: memref<8x128xf32, #tpu.memory_space<vmem>>) attributes {dimension_semantics = [#tpu.dimension_semantics<parallel>], iteration_bounds = array<i64: 1>, scalar_prefetch = 0 : i64, scratch_operands = 0 : i64, tpu.core_type = #tpu.core_type<tc>, window_params = [{transform_indices = @transform_0, window_bounds = array<i64: 8, 128>}, {pipeline_mode = #tpu.pipeline_mode<synchronous>, transform_indices = @transform_1, window_bounds = array<i64: 128, 128>}, {pipeline_mode = #tpu.pipeline_mode<synchronous>, transform_indices = @transform_2, window_bounds = array<i64: 1, 128>}, {pipeline_mode = #tpu.pipeline_mode<synchronous>, transform_indices = @transform_3, window_bounds = array<i64: 128, 128>}, {pipeline_mode = #tpu.pipeline_mode<synchronous>, transform_indices = @transform_4, window_bounds = array<i64: 1, 128>}, {pipeline_mode = #tpu.pipeline_mode<synchronous>, transform_indices = @transform_5, window_bounds = array<i64: 128, 128>}, {pipeline_mode = #tpu.pipeline_mode<synchronous>, transform_indices = @transform_6, window_bounds = array<i64: 1, 128>}, {transform_indices = @transform_7, window_bounds = array<i64: 8, 128>}]} {
    %c0 = arith.constant 0 : index
    %c0_0 = arith.constant 0 : index
    %0 = vector.load %arg1[%c0, %c0_0] : memref<8x128xbf16, #tpu.memory_space<vmem>>, vector<8x128xbf16>
    %c0_1 = arith.constant 0 : index
    %c0_2 = arith.constant 0 : index
    %1 = vector.load %arg6[%c0_1, %c0_2] : memref<128x128xbf16, #tpu.memory_space<vmem>>, vector<128x128xbf16>
    %cst = arith.constant dense<0.000000e+00> : vector<8x128xf32>
    %2 = tpu.matmul %0, %1, %cst {dimension_numbers = #tpu.dot_dimension_numbers<[1], [0], [0], [1], [0, 0, 1, 1], [], []>} : vector<8x128xbf16>, vector<128x128xbf16>, vector<8x128xf32> -> vector<8x128xf32>
    %c0_3 = arith.constant 0 : index
    %c0_4 = arith.constant 0 : index
    %3 = vector.load %arg7[%c0_3, %c0_4] : memref<1x128xf32, #tpu.memory_space<vmem>>, vector<1x128xf32>
    %4 = vector.broadcast %3 : vector<1x128xf32> to vector<8x128xf32>
    %5 = arith.addf %2, %4 : vector<8x128xf32>
    %c0_5 = arith.constant 0 : index
    %c0_6 = arith.constant 0 : index
    %6 = vector.load %arg2[%c0_5, %c0_6] : memref<128x128xbf16, #tpu.memory_space<vmem>>, vector<128x128xbf16>
    %cst_7 = arith.constant dense<0.000000e+00> : vector<8x128xf32>
    %7 = tpu.matmul %0, %6, %cst_7 {dimension_numbers = #tpu.dot_dimension_numbers<[1], [0], [0], [1], [0, 0, 1, 1], [], []>} : vector<8x128xbf16>, vector<128x128xbf16>, vector<8x128xf32> -> vector<8x128xf32>
    %c0_8 = arith.constant 0 : index
    %c0_9 = arith.constant 0 : index
    %8 = vector.load %arg3[%c0_8, %c0_9] : memref<1x128xf32, #tpu.memory_space<vmem>>, vector<1x128xf32>
    %9 = vector.broadcast %8 : vector<1x128xf32> to vector<8x128xf32>
    %10 = arith.addf %7, %9 : vector<8x128xf32>
    %cst_10 = arith.constant 0.000000e+00 : f32
    %11 = vector.broadcast %cst_10 : f32 to vector<8x128xf32>
    %12 = arith.maximumf %10, %11 : vector<8x128xf32>
    %13 = arith.truncf %12 : vector<8x128xf32> to vector<8x128xbf16>
    %c0_11 = arith.constant 0 : index
    %c0_12 = arith.constant 0 : index
    %14 = vector.load %arg4[%c0_11, %c0_12] : memref<128x128xbf16, #tpu.memory_space<vmem>>, vector<128x128xbf16>
    %cst_13 = arith.constant dense<0.000000e+00> : vector<8x128xf32>
    %15 = tpu.matmul %13, %14, %cst_13 {dimension_numbers = #tpu.dot_dimension_numbers<[1], [0], [0], [1], [0, 0, 1, 1], [], []>} : vector<8x128xbf16>, vector<128x128xbf16>, vector<8x128xf32> -> vector<8x128xf32>
    %c0_14 = arith.constant 0 : index
    %c0_15 = arith.constant 0 : index
    %16 = vector.load %arg5[%c0_14, %c0_15] : memref<1x128xf32, #tpu.memory_space<vmem>>, vector<1x128xf32>
    %17 = vector.broadcast %16 : vector<1x128xf32> to vector<8x128xf32>
    %18 = arith.addf %15, %17 : vector<8x128xf32>
    %cst_16 = arith.constant 0.000000e+00 : f32
    %19 = vector.broadcast %cst_16 : f32 to vector<8x128xf32>
    %20 = arith.maximumf %18, %19 : vector<8x128xf32>
    %21 = arith.addf %20, %5 : vector<8x128xf32>
    %cst_17 = arith.constant 0.000000e+00 : f32
    %22 = vector.broadcast %cst_17 : f32 to vector<8x128xf32>
    %23 = arith.maximumf %21, %22 : vector<8x128xf32>
    %c0_18 = arith.constant 0 : index
    %c0_19 = arith.constant 0 : index
    %24 = vector.load %arg8[%c0_18, %c0_19] : memref<8x128xf32, #tpu.memory_space<vmem>>, vector<8x128xf32>
    tpu.vector_store %arg8[%c0_18, %c0_19], %23 {strides = array<i32>} : memref<8x128xf32, #tpu.memory_space<vmem>>, vector<8x128xf32>,
    return
  }
  func.func @transform_0(%arg0: i32) -> (i32, i32) {
    %c0_i32 = arith.constant 0 : i32
    %c0_i32_0 = arith.constant 0 : i32
    return %arg0, %c0_i32 : i32, i32
  }
  func.func @transform_1(%arg0: i32) -> (i32, i32) {
    %c0_i32 = arith.constant 0 : i32
    %c0_i32_0 = arith.constant 0 : i32
    %c0_i32_1 = arith.constant 0 : i32
    return %c0_i32, %c0_i32_0 : i32, i32
  }
  func.func @transform_2(%arg0: i32) -> (i32, i32) {
    %c0_i32 = arith.constant 0 : i32
    %c0_i32_0 = arith.constant 0 : i32
    %c0_i32_1 = arith.constant 0 : i32
    return %c0_i32, %c0_i32_0 : i32, i32
  }
  func.func @transform_3(%arg0: i32) -> (i32, i32) {
    %c0_i32 = arith.constant 0 : i32
    %c0_i32_0 = arith.constant 0 : i32
    %c0_i32_1 = arith.constant 0 : i32
    return %c0_i32, %c0_i32_0 : i32, i32
  }
  func.func @transform_4(%arg0: i32) -> (i32, i32) {
    %c0_i32 = arith.constant 0 : i32
    %c0_i32_0 = arith.constant 0 : i32
    %c0_i32_1 = arith.constant 0 : i32
    return %c0_i32, %c0_i32_0 : i32, i32
  }
  func.func @transform_5(%arg0: i32) -> (i32, i32) {
    %c0_i32 = arith.constant 0 : i32
    %c0_i32_0 = arith.constant 0 : i32
    %c0_i32_1 = arith.constant 0 : i32
    return %c0_i32, %c0_i32_0 : i32, i32
  }
  func.func @transform_6(%arg0: i32) -> (i32, i32) {
    %c0_i32 = arith.constant 0 : i32
    %c0_i32_0 = arith.constant 0 : i32
    %c0_i32_1 = arith.constant 0 : i32
    return %c0_i32, %c0_i32_0 : i32, i32
  }
  func.func @transform_7(%arg0: i32) -> (i32, i32) {
    %c0_i32 = arith.constant 0 : i32
    %c0_i32_0 = arith.constant 0 : i32
    return %arg0, %c0_i32 : i32, i32
  }
}

</mosaic_0001>

<bundles_post_ra>
// kernel: tpu_custom_call.1
= control target key start
LH: loop header
LB: loop body
LE: loop exit
PB: predicated region body
PF: predicated region fallthrough
CT: control target
= control target key end

     0   :  { %12 = vsyncpa [#allocation3], 0  ;;  %s686_s0 = inlined_call_operand.hbm [shape: bf16[8,128], index: 0, kind: input, shape index: {}]   ;;  %s687_s1 = inlined_call_operand.hbm [shape: bf16[128,128], index: 1, kind: input, shape index: {}]   ;;  %s688_s2 = inlined_call_operand.vmem [shape: f32[1,128], index: 2, kind: input, shape index: {}]   ;;  %s689_s3 = inlined_call_operand.hbm [shape: bf16[128,128], index: 3, kind: input, shape index: {}]   ;;  %s690_s4 = inlined_call_operand.vmem [shape: f32[1,128], index: 4, kind: input, shape index: {}]   ;;  %s691_s5 = inlined_call_operand.hbm [shape: bf16[128,128], index: 5, kind: input, shape index: {}]   ;;  %s692_s6 = inlined_call_operand.vmem [shape: f32[1,128], index: 6, kind: input, shape index: {}]   ;;  %s693_s7 = inlined_call_operand.hbm [shape: f32[8,128], index: 7, kind: output, shape index: {}]  }
   0x1   :  { %13 = vsyncpa [#allocation6], 0 }
   0x2   :  { %14 = vsyncpa [#allocation9], 0  ;;  %s31_s26 = sshll.u32 %s687_s1, 4  ;;  %s32_s26 = int_to_ptr.hbm [resolvable:$true] %s31_s26 }
   0x3   :  { %15 = vsyncpa [#allocation4], 0  ;;  %s615_s27 = smov [#allocation5]   ;;  %s21_s8 = sshll.u32 %s686_s0, 4  ;;  %s22_s8 = int_to_ptr.hbm [resolvable:$true] %s21_s8 }
   0x4   :  { %s33_s28 = sshll.u32 %s615_s27, 4  ;;  %s616_s9 = smov 64   ;;  %s34_s28 = int_to_ptr.vmem [resolvable:$true] %s33_s28 }
   0x5   :  { %s617_s10 = smov 4   ;;  %s618_s11 = smov [#allocation2]  }
   0x6   :  { %39 = dma.hbm_to_vmem [thread:$0]  %s32_s26, 1024, %s34_s28, [#allocation6], %s616_s9, %s616_s9, %s617_s10  }
   0x7   :  { %s23_s12 = sshll.u32 %s618_s11, 4  ;;  %s46_s15 = sshll.u32 %s689_s3, 4  ;;  %s24_s12 = int_to_ptr.vmem [resolvable:$true] %s23_s12  ;;  %s47_s15 = int_to_ptr.hbm [resolvable:$true] %s46_s15 }
   0x8   :  { %26 = dma.hbm_to_vmem [thread:$0]  %s22_s8, 64, %s24_s12, [#allocation3]  }
   0x9   :  { %s61_s17 = sshll.u32 %s691_s5, 4  ;;  %s619_s18 = smov [#allocation7]   ;;  %s62_s17 = int_to_ptr.hbm [resolvable:$true] %s61_s17 }
   0xa   :  { %s48_s19 = sshll.u32 %s619_s18, 4  ;;  %s620_s0 = smov [#allocation8]   ;;  %s49_s19 = int_to_ptr.vmem [resolvable:$true] %s48_s19 }
   0xb   :  { %54 = dma.hbm_to_vmem [thread:$0]  %s47_s15, 1024, %s49_s19, [#allocation6], %s616_s9, %s616_s9, %s617_s10  }
   0xc   :  { %s63_s20 = sshll.u32 %s620_s0, 4  ;;  %s64_s20 = int_to_ptr.vmem [resolvable:$true] %s63_s20 }
   0xd   :  { %69 = dma.hbm_to_vmem [thread:$0]  %s62_s17, 1024, %s64_s20, [#allocation9], %s616_s9, %s616_s9, %s617_s10  }
   0xe   :  { %607 = dma.done.wait [#allocation3], 64  }
   0xf   :  { %608 = vsyncadd [#allocation3], 4294967232 }
  0x10   :  { %609 = dma.done.wait [#allocation6], 2048  }
  0x11   :  { %610 = vsyncadd [#allocation6], 4294965248 }
  0x12   :  { %611 = dma.done.wait [#allocation9], 1024  }
  0x13   :  { %612 = vsyncadd [#allocation9], 4294966272  ;;  %v468_v0 = vld [vmem:[#allocation5 + $0x38] sm:$0xff]  ;;  %v467_v1 = vld [vmem:[#allocation5 + $0x30] sm:$0xff]  ;;  %s345_s28 = sshll.u32 %s693_s7, 4  ;;  %s346_s28 = int_to_ptr.hbm [resolvable:$true] %s345_s28 }
  0x14   :  { %238 = vmatpush.bf16.msra.mxu1 %v468_v0  ;;  %v460_v2 = vld [vmem:[#allocation8 + $0x38] sm:$0xff]  ;;  %v459_v4 = vld [vmem:[#allocation8 + $0x30] sm:$0xff]  ;;  %v466_v6 = vld [vmem:[#allocation5 + $0x28] sm:$0xff] }
  0x15   :  { %v476_v3 = vld [vmem:[#allocation7 + $0x38] sm:$0xff]  ;;  %157 = vmatpush.bf16.msra.mxu0 %v460_v2  ;;  %v475_v5 = vld [vmem:[#allocation7 + $0x30] sm:$0xff]  ;;  %v458_v7 = vld [vmem:[#allocation8 + $0x28] sm:$0xff] }
  0x16   :  { %321 = vmatpush.bf16.msra.mxu2 %v476_v3  ;;  %v474_v8 = vld [vmem:[#allocation7 + $0x28] sm:$0xff]  ;;  %v465_v9 = vld [vmem:[#allocation5 + $0x20] sm:$0xff]  ;;  %v464_v12 = vld [vmem:[#allocation5 + $0x18] sm:$0xff] }
  0x17   :  { %v457_v10 = vld [vmem:[#allocation8 + $0x20] sm:$0xff]  ;;  %v456_v13 = vld [vmem:[#allocation8 + $0x18] sm:$0xff]  ;;  %v463_v15 = vld [vmem:[#allocation5 + $0x10] sm:$0xff] }
  0x18   :  { %239 = vmatpush.bf16.msra.mxu1 %v467_v1  ;;  %v473_v11 = vld [vmem:[#allocation7 + $0x20] sm:$0xff]  ;;  %v472_v14 = vld [vmem:[#allocation7 + $0x18] sm:$0xff]  ;;  %v455_v16 = vld [vmem:[#allocation8 + $0x10] sm:$0xff] }
  0x19   :  { %158 = vmatpush.bf16.msra.mxu0 %v459_v4  ;;  %v471_v17 = vld [vmem:[#allocation7 + $0x10] sm:$0xff]  ;;  %v462_v18 = vld [vmem:[#allocation5 + $0x8] sm:$0xff]  ;;  %v461_v20 = vld [vmem:[#allocation5] sm:$0xff] }
  0x1a   :  { %322 = vmatpush.bf16.msra.mxu2 %v475_v5  ;;  %v454_v19 = vld [vmem:[#allocation8 + $0x8] sm:$0xff]  ;;  %v88_v21 = vld [vmem:[#allocation2] sm:$0xf]  ;;  %v453_v23 = vld [vmem:[#allocation8] sm:$0xff] }
  0x1b   :  { %v470_v22 = vld [vmem:[#allocation7 + $0x8] sm:$0xff]  ;;  %v469_v24 = vld [vmem:[#allocation7] sm:$0xff]  ;;  %v484_v25 = vld [vmem:[%s688_s2] ss:$0 sm:$0xff]  ;;  %s621_s2 = smov [#allocation10]  }
  0x1c   :  { %240 = vmatpush.bf16.msra.mxu1 %v466_v6  ;;  %v485_v33 = vld [vmem:[%s692_s6] ss:$0 sm:$0xff]  ;;  %s343_s25 = sshll.u32 %s621_s2, 4  ;;  %s344_s25 = int_to_ptr.vmem [resolvable:$true] %s343_s25 }
  0x1d   :  { %159 = vmatpush.bf16.msra.mxu0 %v458_v7  ;;  %v486_v34 = vld [vmem:[%s690_s4] ss:$0 sm:$0xff] }
  0x1e   :  { %323 = vmatpush.bf16.msra.mxu2 %v474_v8 }
  0x20   :  { %241 = vmatpush.bf16.msra.mxu1 %v465_v9 }
  0x21   :  { %160 = vmatpush.bf16.msra.mxu0 %v457_v10 }
  0x22   :  { %324 = vmatpush.bf16.msra.mxu2 %v473_v11 }
  0x24   :  { %242 = vmatpush.bf16.msra.mxu1 %v464_v12 }
  0x25   :  { %161 = vmatpush.bf16.msra.mxu0 %v456_v13 }
  0x26   :  { %325 = vmatpush.bf16.msra.mxu2 %v472_v14 }
  0x28   :  { %243 = vmatpush.bf16.msra.mxu1 %v463_v15 }
  0x29   :  { %162 = vmatpush.bf16.msra.mxu0 %v455_v16 }
  0x2a   :  { %326 = vmatpush.bf16.msra.mxu2 %v471_v17 }
  0x2c   :  { %244 = vmatpush.bf16.msra.mxu1 %v462_v18 }
  0x2d   :  { %163 = vmatpush.bf16.msra.mxu0 %v454_v19 }
  0x2e   :  { %327 = vmatpush.bf16.msra.mxu2 %v470_v22 }
  0x30   :  { %245 = vmatpush.bf16.msra.mxu1 %v461_v20 }
  0x31   :  { %164 = vmatpush.bf16.msra.mxu0 %v453_v23 }
  0x32   :  { %328 = vmatpush.bf16.msra.mxu2 %v469_v24 }
  0x33   :  { %246 = vmatmul.bf16.vlgmr.msra.gmra.mxu1 %v88_v21 }
  0x34   :  { %165 = vmatmul.bf16.vlgmr.msra.gmra.mxu0 %v88_v21 }
  0xb0   :  { %v247_v26 = vpop.f32.mrf.mxu1 }
  0xb1   :  { %v248_v27 = vadd.f32 %v484_v25, %v247_v26  ;;  %v166_v31 = vpop.f32.mrf.mxu0 }
  0xb2   :  { %v167_v36 = vadd.f32 %v485_v33, %v166_v31 }
  0xb3   :  { %v251_v28 = vmax.f32 %v248_v27, 0.0 }
  0xb5   :  { %v252_v29 = vpack.c.bf16 %v251_v28, %v251_v28 }
  0xb7   :  { %329 = vmatmul.bf16.vlgmr.msra.gmra.mxu2 %v252_v29 }
  0xb8   :  { %v249_v30 = vpop.f32.mrf.mxu1 }
  0xb9   :  { %v168_v32 = vpop.f32.mrf.mxu0 }
 0x13a   :  { %v330_v35 = vpop.f32.mrf.mxu2 }
 0x13b   :  { %v331_v37 = vadd.f32 %v486_v34, %v330_v35 }
 0x13d   :  { %v334_v38 = vmax.f32 %v331_v37, 0.0 }
 0x13f   :  { %v335_v39 = vadd.f32 %v334_v38, %v167_v36 }
 0x141   :  { %v336_v40 = vmax.f32 %v335_v39, 0.0 }
 0x142   :  { %v332_v41 = vpop.f32.mrf.mxu2 }
 0x143   :  { %337 = vst [vmem:[#allocation10] sm:$0xff] %v336_v40 }
 0x144   :  { %348 = dma.vmem_to_hbm [thread:$0]  %s344_s25, 128, %s346_s28, [#allocation4]  }
 0x145   :  { %613 = dma.done.wait [#allocation4], 128  }
 0x146   :  { %614 = vsyncadd [#allocation4], 4294967168 }
 0x147   :  { %353 = vsyncpa [#allocation3], 1 }
 0x148   :  { %354 = vsyncpa [#allocation6], 1 }
 0x149   :  { %355 = vsyncpa [#allocation9], 1 }
 0x14a   :  { %356 = vsyncpa [#allocation4], 1 }

</bundles_post_ra>
